<compile_context>
chip_gen: v7x
topology: tpu7x:2x2x1
jax: 0.10.0
libtpu: 0.0.40
codegen_flags: <defaults>
</compile_context>

<pallas_src>
import random
import numpy as np
import jax
import jax.numpy as jnp
from jax.experimental import pallas as pl
from jax.experimental.pallas import tpu as pltpu


def _round_up(x, m):
    return ((x + m - 1) // m) * m


def _choose_tiles(B, U, D):
    """Large VMEM-filling tiles (cross-generation safe, ~18 MiB max buffered)."""
    # LHS row tile: up to 512 (>=256 keeps the 256x256 MXU weight tile hot on
    # v6e/v7x); multiple of 16 for bf16 sublane packing.
    tm = _round_up(min(max(B, 1), 512), 16)
    Bp = _round_up(B, tm)
    # Output lane tile: up to 1024, multiple of 128 (lane-dense stores).
    tn = _round_up(min(max(D, 1), 1024), 128)
    Dp = _round_up(D, tn)
    # Reduction tile: whole U when it fits, else 2048.
    tk = _round_up(min(max(U, 1), 2048), 128)
    Up = _round_up(U, tk)

    # v7x megacore: expose >=2 parallel (i, j) blocks whenever dims allow,
    # otherwise one of the two TensorCores idles.
    if (Bp // tm) * (Dp // tn) < 2:
        if tn == Dp and Dp % 256 == 0:
            tn = Dp // 2
        elif tm == Bp and Bp % 32 == 0:
            tm = Bp // 2
    return tm, tn, tk, Bp, Dp, Up


def mean_agg_kernel(mask_ref, emb_ref, inv_ref, out_ref, acc_ref):
    # mask_ref: (tm, tk) bf16 binary mask tile
    # emb_ref:  (tk, tn) bf16 embedding tile
    # inv_ref:  (tm, 1)  f32 exact 1/num_neigh (host-computed)
    # acc_ref:  (tm, tn) f32 matmul accumulator (scratch, persists over k)
    k = pl.program_id(2)

    @pl.when(k == 0)
    def _():
        acc_ref[...] = jnp.zeros_like(acc_ref)

    acc_ref[...] += jnp.dot(mask_ref[...], emb_ref[...],
                            preferred_element_type=jnp.float32)

    @pl.when(k == pl.num_programs(2) - 1)
    def _():
        out_ref[...] = (acc_ref[...] * inv_ref[...]).astype(out_ref.dtype)


def mean_aggregate_pallas(mask_np, emb_np):
    """mask_np: (B, U) f32 binary numpy; emb_np: (U, D) f32 numpy.
    Returns (B, D) f32 jax array."""
    B, U = mask_np.shape
    U2, D = emb_np.shape
    assert U == U2
    tm, tn, tk, Bp, Dp, Up = _choose_tiles(B, U, D)

    # Host-side pad + exact bf16 cast of the 0/1 mask (no device pad ops).
    mask_p = np.zeros((Bp, Up), dtype=jnp.bfloat16)
    mask_p[:B, :U] = mask_np.astype(jnp.bfloat16)
    emb_p = np.zeros((Up, Dp), dtype=jnp.bfloat16)
    emb_p[:U, :D] = emb_np.astype(jnp.bfloat16)

    # Exact f32 inverse neighbor count on the host (zero-neighbor rows -> 1,
    # matching the PyTorch module). Padded rows get 1.0 (their acc is 0).
    counts = mask_np.sum(axis=1).astype(np.float32)
    counts[counts == 0.0] = 1.0
    inv_p = np.ones((Bp, 1), dtype=np.float32)
    inv_p[:B, 0] = 1.0 / counts

    grid = (Bp // tm, Dp // tn, Up // tk)
    out_p = pl.pallas_call(
        mean_agg_kernel,
        out_shape=jax.ShapeDtypeStruct((Bp, Dp), jnp.float32),
        grid_spec=pltpu.PrefetchScalarGridSpec(
            num_scalar_prefetch=0,
            grid=grid,
            in_specs=[
                pl.BlockSpec((tm, tk), lambda i, j, k: (i, k)),
                pl.BlockSpec((tk, tn), lambda i, j, k: (k, j)),
                pl.BlockSpec((tm, 1), lambda i, j, k: (i, 0)),
            ],
            out_specs=pl.BlockSpec((tm, tn), lambda i, j, k: (i, j)),
            scratch_shapes=[
                pltpu.VMEM((tm, tn), jnp.float32),
            ],
        ),
        compiler_params=pltpu.CompilerParams(
            dimension_semantics=("parallel", "parallel", "arbitrary"),
            # Max buffered footprint ~18 MiB; raise the scoped limit (v5e
            # default is 16 MiB) while staying under v7x's 64 MiB physical.
            vmem_limit_bytes=48 * 1024 * 1024),
    )(jnp.asarray(mask_p), jnp.asarray(emb_p), jnp.asarray(inv_p))
    return out_p[:B, :D]


class MeanAggregatorJAX:
    """JAX/Pallas port of the PyTorch MeanAggregator forward
    (features given as a dense (N, D) array — the torch.Tensor branch)."""

    def __init__(self, features, gcn=False, py_rng=None):
        self.features = np.asarray(features, dtype=np.float32)
        self.gcn = gcn
        self.rng = py_rng if py_rng is not None else random.Random(0)
        # Captured kernel inputs (for exact-input reference checking).
        self._last_mask = None
        self._last_embed = None

    def forward(self, nodes, to_neighs, num_sample=10):
        # ---- host-side graph bookkeeping (same semantics as PyTorch) ----
        if num_sample is not None:
            samp_neighs = [
                set(self.rng.sample(sorted(tn), num_sample))
                if len(tn) >= num_sample else set(tn)
                for tn in to_neighs
            ]
        else:
            samp_neighs = [set(t) for t in to_neighs]
        if self.gcn:
            samp_neighs = [sn | {nodes[i]} for i, sn in enumerate(samp_neighs)]

        unique_nodes_list = list(set.union(*samp_neighs))
        unique_nodes = {n: i for i, n in enumerate(unique_nodes_list)}

        B = len(samp_neighs)
        U = len(unique_nodes_list)
        mask_np = np.zeros((B, U), dtype=np.float32)
        cols = [unique_nodes[n] for sn in samp_neighs for n in sn]
        rows = [i for i in range(B) for _ in range(len(samp_neighs[i]))]
        mask_np[rows, cols] = 1.0

        embed_np = self.features[np.asarray(unique_nodes_list, dtype=np.int64)]

        self._last_mask = mask_np
        self._last_embed = embed_np

        # ---- device-side hot path: fused matmul + mean-normalize ----
        return mean_aggregate_pallas(mask_np, embed_np)


if __name__ == "__main__":
    # Deterministic synthetic graph + feature table (small shapes).
    N_TOTAL = 40     # nodes in graph / rows of feature table
    D = 32           # feature dim
    BATCH = 8        # nodes in the batch
    NUM_SAMPLE = 10

    key = jax.random.PRNGKey(0)
    features = jax.random.normal(key, (N_TOTAL, D), dtype=jnp.float32)

    graph_rng = random.Random(0)
    nodes = list(range(BATCH))
    to_neighs = []
    for _ in nodes:
        deg = graph_rng.randint(3, 15)
        to_neighs.append(set(graph_rng.sample(range(N_TOTAL), deg)))

    agg = MeanAggregatorJAX(features, gcn=False, py_rng=random.Random(1))
    out = agg.forward(nodes, to_neighs, num_sample=NUM_SAMPLE)
    out = jax.block_until_ready(out)

    # Reference computed from the EXACT mask / embed matrix the kernel saw.
    mask_ref = agg._last_mask
    emb_ref = agg._last_embed
    num_neigh = mask_ref.sum(1, keepdims=True)
    num_neigh[num_neigh == 0] = 1.0
    ref = (mask_ref / num_neigh) @ emb_ref

    # Tolerance accounts for bf16 embedding operands (f32 accumulate, exact
    # host-side division).
    np.testing.assert_allclose(np.asarray(out), ref, rtol=1e-2, atol=2e-2)
    assert out.shape == (BATCH, D) and out.dtype == jnp.float32
    print("KERNEL_OK")
</pallas_src>

<mosaic_0001>
module attributes {stable_mosaic.version = 11 : i64} {
  func.func @mean_agg_kernel(%arg0: i32, %arg1: i32, %arg2: i32, %arg3: memref<16x128xbf16, #tpu.memory_space<vmem>>, %arg4: memref<128x128xbf16, #tpu.memory_space<vmem>>, %arg5: memref<16x1xf32, #tpu.memory_space<vmem>>, %arg6: memref<16x128xf32, #tpu.memory_space<vmem>>, %arg7: memref<16x128xf32, #tpu.memory_space<vmem>>) attributes {dimension_semantics = [#tpu.dimension_semantics<parallel>, #tpu.dimension_semantics<parallel>, #tpu.dimension_semantics<arbitrary>], iteration_bounds = array<i64: 1, 1, 1>, scalar_prefetch = 0 : i64, scratch_operands = 1 : i64, tpu.core_type = #tpu.core_type<tc>, window_params = [{transform_indices = @transform_0, window_bounds = array<i64: 16, 128>}, {transform_indices = @transform_1, window_bounds = array<i64: 128, 128>}, {transform_indices = @transform_2, window_bounds = array<i64: 16, 1>}, {transform_indices = @transform_3, window_bounds = array<i64: 16, 128>}]} {
    %c0_i32 = arith.constant 0 : i32
    %0 = arith.cmpi eq, %arg2, %c0_i32 : i32
    %1 = arith.extui %0 : i1 to i32
    %c0_i32_0 = arith.constant 0 : i32
    %2 = arith.cmpi ne, %1, %c0_i32_0 : i32
    scf.if %2 {
      %cst_10 = arith.constant 0.000000e+00 : f32
      %12 = vector.broadcast %cst_10 : f32 to vector<16x128xf32>
      %c0_11 = arith.constant 0 : index
      %c0_12 = arith.constant 0 : index
      %13 = vector.load %arg7[%c0_11, %c0_12] : memref<16x128xf32, #tpu.memory_space<vmem>>, vector<16x128xf32>
      tpu.vector_store %arg7[%c0_11, %c0_12], %12 {strides = array<i32>} : memref<16x128xf32, #tpu.memory_space<vmem>>, vector<16x128xf32>,
    } else {
    }
    %c0 = arith.constant 0 : index
    %c0_1 = arith.constant 0 : index
    %3 = vector.load %arg7[%c0, %c0_1] : memref<16x128xf32, #tpu.memory_space<vmem>>, vector<16x128xf32>
    %c0_2 = arith.constant 0 : index
    %c0_3 = arith.constant 0 : index
    %4 = vector.load %arg3[%c0_2, %c0_3] : memref<16x128xbf16, #tpu.memory_space<vmem>>, vector<16x128xbf16>
    %c0_4 = arith.constant 0 : index
    %c0_5 = arith.constant 0 : index
    %5 = vector.load %arg4[%c0_4, %c0_5] : memref<128x128xbf16, #tpu.memory_space<vmem>>, vector<128x128xbf16>
    %cst = arith.constant dense<0.000000e+00> : vector<16x128xf32>
    %6 = tpu.matmul %4, %5, %cst {dimension_numbers = #tpu.dot_dimension_numbers<[1], [0], [0], [1], [0, 0, 1, 1], [], []>} : vector<16x128xbf16>, vector<128x128xbf16>, vector<16x128xf32> -> vector<16x128xf32>
    %7 = arith.addf %3, %6 : vector<16x128xf32>
    %c0_6 = arith.constant 0 : index
    %c0_7 = arith.constant 0 : index
    %8 = vector.load %arg7[%c0_6, %c0_7] : memref<16x128xf32, #tpu.memory_space<vmem>>, vector<16x128xf32>
    tpu.vector_store %arg7[%c0_6, %c0_7], %7 {strides = array<i32>} : memref<16x128xf32, #tpu.memory_space<vmem>>, vector<16x128xf32>,
    %c0_i32_8 = arith.constant 0 : i32
    %9 = arith.cmpi eq, %arg2, %c0_i32_8 : i32
    %10 = arith.extui %9 : i1 to i32
    %c0_i32_9 = arith.constant 0 : i32
    %11 = arith.cmpi ne, %10, %c0_i32_9 : i32
    scf.if %11 {
      %c0_10 = arith.constant 0 : index
      %c0_11 = arith.constant 0 : index
      %12 = vector.load %arg7[%c0_10, %c0_11] : memref<16x128xf32, #tpu.memory_space<vmem>>, vector<16x128xf32>
      %c0_12 = arith.constant 0 : index
      %c0_13 = arith.constant 0 : index
      %13 = vector.load %arg5[%c0_12, %c0_13] : memref<16x1xf32, #tpu.memory_space<vmem>>, vector<16x1xf32>
      %14 = vector.broadcast %13 : vector<16x1xf32> to vector<16x128xf32>
      %15 = arith.mulf %12, %14 : vector<16x128xf32>
      %c0_14 = arith.constant 0 : index
      %c0_15 = arith.constant 0 : index
      %16 = vector.load %arg6[%c0_14, %c0_15] : memref<16x128xf32, #tpu.memory_space<vmem>>, vector<16x128xf32>
      tpu.vector_store %arg6[%c0_14, %c0_15], %15 {strides = array<i32>} : memref<16x128xf32, #tpu.memory_space<vmem>>, vector<16x128xf32>,
    } else {
    }
    return
  }
  func.func @transform_0(%arg0: i32, %arg1: i32, %arg2: i32) -> (i32, i32) {
    %c0_i32 = arith.constant 0 : i32
    return %arg0, %arg2 : i32, i32
  }
  func.func @transform_1(%arg0: i32, %arg1: i32, %arg2: i32) -> (i32, i32) {
    %c0_i32 = arith.constant 0 : i32
    return %arg2, %arg1 : i32, i32
  }
  func.func @transform_2(%arg0: i32, %arg1: i32, %arg2: i32) -> (i32, i32) {
    %c0_i32 = arith.constant 0 : i32
    %c0_i32_0 = arith.constant 0 : i32
    return %arg0, %c0_i32 : i32, i32
  }
  func.func @transform_3(%arg0: i32, %arg1: i32, %arg2: i32) -> (i32, i32) {
    %c0_i32 = arith.constant 0 : i32
    return %arg0, %arg1 : i32, i32
  }
}

</mosaic_0001>

<bundles_post_ra>
// kernel: tpu_custom_call.1
= control target key start
LH: loop header
LB: loop body
LE: loop exit
PB: predicated region body
PF: predicated region fallthrough
CT: control target
= control target key end

     0   :  { %8 = vsyncpa [#allocation4], 0  ;;  %s360_s0 = inlined_call_operand.vmem [shape: bf16[16,128], index: 0, kind: input, shape index: {}]   ;;  %s361_s1 = inlined_call_operand.hbm [shape: bf16[128,128], index: 1, kind: input, shape index: {}]   ;;  %s362_s2 = inlined_call_operand.vmem [shape: f32[16,1], index: 2, kind: input, shape index: {}]   ;;  %s363_s3 = inlined_call_operand.hbm [shape: f32[16,128], index: 3, kind: output, shape index: {}]  }
   0x1   :  { %9 = vsyncpa [#allocation5], 0  ;;  %s298_s12 = smov [#allocation3]   ;;  %s250_s16 = scalar_lea.hbm %s361_s1, 1024 }
   0x2   :  { %s17_s13 = sshll.u32 %s298_s12, 4  ;;  %p251_p0 = scmp.ne.s32.totalorder %s361_s1, %s250_s16  ;;  %s18_s13 = int_to_ptr.vmem [resolvable:$true] %s17_s13 }
   0x3   :  { %p254_p1 = scmp.lt.u32.totalorder %s250_s16, %s361_s1 }
   0x5   :  { %p256_p2 = pnand %p254_p1, %p251_p0 }
   0x7   :  { %259 = shalt.err (!%p256_p2)
}
   0x8   :  { %s260_s21 = scalar_lea.vmem %s18_s13, 1024  ;;  %p265_p4 = scmp.lt.s32.totalorder %s18_s13, %s18_s13 }
   0x9   :  { %p261_p3 = scmp.ne.s32.totalorder %s18_s13, %s260_s21  ;;  %p266_p5 = scmp.lt.s32.totalorder %s260_s21, %s260_s21 }
   0xb   :  { %p267_p6 = por %p266_p5, %p265_p4 }
   0xd   :  { %p268_p7 = pnand %p267_p6, %p261_p3 }
   0xf   :  { %271 = shalt.err (!%p268_p7)
}
  0x10   :  { %s299_s22 = smov 64   ;;  %s300_s23 = smov 4  }
  0x11   :  { %23 = dma.hbm_to_vmem [thread:$0]  %s361_s1, 1024, %s18_s13, [#allocation4], %s299_s22, %s299_s22, %s300_s23  }
  0x12   :  { %294 = dma.done.wait [#allocation4], 1024  }
  0x13   :  { %295 = vsyncadd [#allocation4], 4294966272  ;;  %v301_v0 = vmov 0.0   ;;  %vm302_vm0 = vmmov 0   ;;  %v303_v1 = vmov 0   ;;  %v241_v2 = vld [vmem:[#allocation3] sm:$0xff]  }
  0x14   :  { %211 = vmatprep.subr.bf16.mxu0 %v301_v0  ;;  %227 = vmatprep.mubr.msk.bf16.mxu0 %vm302_vm0, %v301_v0  ;;  %v242_v3 = vld [vmem:[#allocation3 + $0x8] sm:$0xff]   ;;  %v243_v4 = vld [vmem:[#allocation3 + $0x10] sm:$0xff]   ;;  %v160_v5 = vld [vmem:[%s362_s2] sm:$0xff] }
  0x15   :  { %240 = vset.pattern.permute.xlu0 %v303_v1  ;;  %212 = vmatpush3.bf16.msra.mxu0 %v241_v2  ;;  %v244_v6 = vld [vmem:[#allocation3 + $0x18] sm:$0xff]   ;;  %v161_v7 = vld [vmem:[%s362_s2 + $0x8] sm:$0xff]  ;;  %v245_v8 = vld [vmem:[#allocation3 + $0x20] sm:$0xff]   ;;  %s304_s2 = smov [#allocation6]  }
  0x16   :  { %213 = vmatprep.subr.bf16.mxu0 %v301_v0  ;;  %164 = vperm.xlu0 %240, %v160_v5   ;;  %v246_v9 = vld [vmem:[#allocation3 + $0x28] sm:$0xff]   ;;  %v247_v10 = vld [vmem:[#allocation3 + $0x30] sm:$0xff]   ;;  %v248_v11 = vld [vmem:[#allocation3 + $0x38] sm:$0xff]   ;;  %s181_s4 = sshll.u32 %s304_s2, 4  ;;  %s182_s4 = int_to_ptr.vmem [resolvable:$true] %s181_s4 }
  0x17   :  { %v249_v12 = vld [vmem:[%s360_s0] sm:$0xff]   ;;  %s272_s5 = scalar_lea.vmem %s182_s4, 256  ;;  %p277_p9 = scmp.lt.s32.totalorder %s182_s4, %s182_s4 }
  0x18   :  { %p273_p8 = scmp.ne.s32.totalorder %s182_s4, %s272_s5  ;;  %p278_p10 = scmp.lt.s32.totalorder %s272_s5, %s272_s5 }
  0x19   :  { %214 = vmatpush3.bf16.msra.mxu0 %v242_v3 }
  0x1a   :  { %215 = vmatprep.subr.bf16.mxu0 %v301_v0  ;;  %169 = vperm.xlu0 %240, %v161_v7   ;;  %p279_p11 = por %p278_p10, %p277_p9 }
  0x1c   :  { %p280_p12 = pnand %p279_p11, %p273_p8 }
  0x1d   :  { %216 = vmatpush3.bf16.msra.mxu0 %v243_v4 }
  0x1e   :  { %217 = vmatprep.subr.bf16.mxu0 %v301_v0 }
  0x21   :  { %218 = vmatpush3.bf16.msra.mxu0 %v244_v6 }
  0x22   :  { %219 = vmatprep.subr.bf16.mxu0 %v301_v0 }
  0x25   :  { %220 = vmatpush3.bf16.msra.mxu0 %v245_v8 }
  0x26   :  { %221 = vmatprep.subr.bf16.mxu0 %v301_v0 }
  0x29   :  { %222 = vmatpush3.bf16.msra.mxu0 %v246_v9 }
  0x2a   :  { %223 = vmatprep.subr.bf16.mxu0 %v301_v0 }
  0x2d   :  { %224 = vmatpush3.bf16.msra.mxu0 %v247_v10 }
  0x2e   :  { %225 = vmatprep.subr.bf16.mxu0 %v301_v0 }
  0x31   :  { %226 = vmatpush3.bf16.msra.mxu0 %v248_v11 }
  0x34   :  { %228 = vmatmul.mubr.bf16.vlgmr.msra.gmra.mrb[0].mxu0 %v249_v12 }
  0x95   :  { %v165_v13 = vpop.permute.xlu0 %164 }
  0x99   :  { %v170_v17 = vpop.permute.xlu0 %169 }
 0x107   :  { %v144_v14 = vpop.f32.mrb[0].mxu0 }
 0x108   :  { %v172_v15 = vmul.f32 %v165_v13, %v144_v14  ;;  %v229_v16 = vpop.f32.mrb[1].mxu0 }
 0x109   :  { %v147_v18 = vpop.f32.mrb[2].mxu0 }
 0x10a   :  { %174 = vst [vmem:[#allocation6] sm:$0xff] %v172_v15  ;;  %v173_v19 = vmul.f32 %v170_v17, %v147_v18  ;;  %v230_v20 = vpop.f32.mrb[3].mxu0 }
 0x10c   :  { %175 = vst [vmem:[#allocation6 + $0x8] sm:$0xff] %v173_v19 }
 0x10d   :  { %283 = shalt.err (!%p280_p12)
}
 0x10e   :  { %s284_s7 = scalar_lea.hbm %s363_s3, 256 }
 0x10f   :  { %p285_p13 = scmp.ne.s32.totalorder %s363_s3, %s284_s7  ;;  %p288_p0 = scmp.lt.u32.totalorder %s284_s7, %s363_s3 }
 0x111   :  { %p290_p1 = pnand %p288_p0, %p285_p13 }
 0x113   :  { %293 = shalt.err (!%p290_p1)
}
 0x114   :  { %s305_s12 = smov 128   ;;  %s306_s13 = smov 8  }
 0x115   :  { %187 = dma.vmem_to_hbm [thread:$0]  %s182_s4, 256, %s363_s3, [#allocation5], %s305_s12, %s305_s12, %s306_s13  }
 0x116   :  { %296 = dma.done.wait [#allocation5], 256  }
 0x117   :  { %297 = vsyncadd [#allocation5], 4294967040 }
 0x118   :  { %191 = vsyncpa [#allocation4], 1 }
 0x119   :  { %192 = vsyncpa [#allocation5], 1 }

</bundles_post_ra>
